<compile_context>
chip_gen: v6e
topology: v6e:2x2x1
jax: 0.10.0
libtpu: 0.0.40
codegen_flags: <defaults>
</compile_context>

<pallas_src>
import functools

import jax
import jax.numpy as jnp
from jax.experimental import pallas as pl
from jax.experimental.pallas import tpu as pltpu


_LANES = 128


def _fal_kernel(x_ref, w0_ref, w12_ref, vec_ref, o_ref):
    """Fused Linear -> HighWay(gated) -> Dropout(eval) -> BatchNorm1d(eval).

    Packed-layout shapes (p original rows folded into the lane axis):
      x_ref   : (tm, p*in_dim)
      w0_ref  : (p*in_dim, Dp)   block-diag of p copies of W0
      w12_ref : (Dp, 2*Dp)       [W1_blockdiag | W2_blockdiag]
      vec_ref : (5, Dp)          rows: b0, b1, b2, bn_scale, bn_shift
      o_ref   : (tm, Dp)
    """
    dp = o_ref.shape[1]
    vec = vec_ref[...]

    # --- Linear(input_dim -> output_dim) ---
    h0 = jnp.dot(x_ref[...], w0_ref[...],
                 preferred_element_type=jnp.float32) + vec[0:1, :]

    # --- HighWay(output_dim, with_gate=True): one fused matmul, then slice ---
    hpre = jnp.dot(h0, w12_ref[...], preferred_element_type=jnp.float32)
    gate = jax.nn.sigmoid(hpre[:, dp:] + vec[2:3, :])
    hw = gate * h0 + (1.0 - gate) * jnp.tanh(hpre[:, :dp] + vec[1:2, :])

    # --- Dropout (eval: identity) + BatchNorm1d (eval: folded affine) ---
    o_ref[...] = hw * vec[3:4, :] + vec[4:5, :]


def _pack_factor(in_dim, out_dim):
    """How many original rows to pack per 128-lane slab (1 disables packing)."""
    d = max(in_dim, out_dim)
    if d < _LANES and _LANES % in_dim == 0 and _LANES % out_dim == 0:
        return _LANES // d
    return 1


def _block_diag(w, p):
    """(i, o) -> (p*i, p*o) block-diagonal matrix with p copies of w."""
    if p == 1:
        return w
    i, o = w.shape
    eye = jnp.eye(p, dtype=w.dtype)
    return jnp.einsum("pq,io->piqo", eye, w).reshape(p * i, p * o)


@functools.partial(jax.jit, static_argnames=("tm_rows",))
def feature_aggregation_layer(x, params, *, tm_rows=512):
    """x: (..., input_dim) float32; returns same leading shape with output_dim."""
    in_dim = x.shape[-1]
    lead_shape = x.shape[:-1]
    w0, b0, w1, b1, w2, b2, gamma, beta, run_mean, run_var = params
    out_dim = w0.shape[1]
    eps = 1e-5

    # Lane-packing factor and tile bookkeeping (all static under jit).
    p = _pack_factor(in_dim, out_dim)
    tm_rows = max(p, (tm_rows // p) * p)   # row tile must be a multiple of p
    tm_p = tm_rows // p                    # packed-row tile handed to the kernel
    dp_in = p * in_dim
    dp = p * out_dim

    # Flatten rows and zero-pad to a multiple of the row tile (padded rows are
    # harmless: every op is row-wise; they are sliced off afterwards).
    x2 = x.reshape(-1, in_dim)
    n_rows = x2.shape[0]
    n_pad = pl.cdiv(n_rows, tm_rows) * tm_rows
    if n_pad != n_rows:
        x2 = jnp.pad(x2, ((0, n_pad - n_rows), (0, 0)))
    x_packed = x2.reshape(n_pad // p, dp_in)

    # Fold BatchNorm1d (eval mode) into per-feature scale / shift.
    inv_std = gamma / jnp.sqrt(run_var + eps)
    bn_scale = inv_std
    bn_shift = beta - run_mean * inv_std

    # Lane-packed weights: block-diag copies keep matmuls / stores lane-dense.
    w0_bd = _block_diag(w0, p)
    w12_bd = jnp.concatenate([_block_diag(w1, p), _block_diag(w2, p)], axis=1)

    # All per-feature vectors in a single resident (5, Dp) block.
    vec = jnp.stack(
        [jnp.tile(b0, p), jnp.tile(b1, p), jnp.tile(b2, p),
         jnp.tile(bn_scale, p), jnp.tile(bn_shift, p)], axis=0)

    # For large row counts the grid has >= 2 parallel steps, so both v7x
    # TensorCores get work; tiny demo inputs collapse to grid=(1,).
    grid = (n_pad // tm_rows,)

    out_packed = pl.pallas_call(
        _fal_kernel,
        out_shape=jax.ShapeDtypeStruct((n_pad // p, dp), jnp.float32),
        grid_spec=pltpu.PrefetchScalarGridSpec(
            num_scalar_prefetch=0,
            grid=grid,
            in_specs=[
                pl.BlockSpec((tm_p, dp_in), lambda i: (i, 0)),   # x (lane packed)
                pl.BlockSpec((dp_in, dp), lambda i: (0, 0)),     # W0 block-diag
                pl.BlockSpec((dp, 2 * dp), lambda i: (0, 0)),    # [W1 | W2] block-diag
                pl.BlockSpec((5, dp), lambda i: (0, 0)),         # biases + BN affine
            ],
            out_specs=pl.BlockSpec((tm_p, dp), lambda i: (i, 0)),
        ),
        compiler_params=pltpu.CompilerParams(
            dimension_semantics=("parallel",),
        ),
    )(x_packed, w0_bd, w12_bd, vec)

    out2 = out_packed.reshape(n_pad, out_dim)[:n_rows]
    return out2.reshape(*lead_shape, out_dim)


def init_params(key, input_dim, output_dim):
    ks = jax.random.split(key, 8)
    scale0 = 1.0 / jnp.sqrt(input_dim)
    scale1 = 1.0 / jnp.sqrt(output_dim)
    # Linear weights stored as (in, out) = PyTorch weight.T
    w0 = jax.random.uniform(ks[0], (input_dim, output_dim), jnp.float32, -scale0, scale0)
    b0 = jax.random.uniform(ks[1], (output_dim,), jnp.float32, -scale0, scale0)
    w1 = jax.random.uniform(ks[2], (output_dim, output_dim), jnp.float32, -scale1, scale1)
    b1 = jax.random.uniform(ks[3], (output_dim,), jnp.float32, -scale1, scale1)
    w2 = jax.random.uniform(ks[4], (output_dim, output_dim), jnp.float32, -scale1, scale1)
    b2 = jax.random.uniform(ks[5], (output_dim,), jnp.float32, -scale1, scale1)
    # BatchNorm1d params / running stats (deterministic, non-trivial).
    gamma = 1.0 + 0.1 * jax.random.normal(ks[6], (output_dim,), jnp.float32)
    beta = 0.1 * jax.random.normal(ks[7], (output_dim,), jnp.float32)
    run_mean = jnp.zeros((output_dim,), jnp.float32)
    run_var = jnp.ones((output_dim,), jnp.float32)
    return (w0, b0, w1, b1, w2, b2, gamma, beta, run_mean, run_var)


def reference_forward(x, params):
    """Pure-JAX reference of the eval-mode PyTorch forward."""
    w0, b0, w1, b1, w2, b2, gamma, beta, run_mean, run_var = params
    h0 = x @ w0 + b0
    y = jnp.tanh(h0 @ w1 + b1)
    gate = jax.nn.sigmoid(h0 @ w2 + b2)
    hw = gate * h0 + (1.0 - gate) * y
    eps = 1e-5
    return (hw - run_mean) / jnp.sqrt(run_var + eps) * gamma + beta


if __name__ == "__main__":
    input_dim, output_dim = 32, 32
    batch, seq = 2, 8  # N = 16 rows (padded to one 512-row tile inside)

    key = jax.random.PRNGKey(0)
    k_x, k_p = jax.random.split(key)
    x = jax.random.normal(k_x, (batch, seq, input_dim), jnp.float32)
    params = init_params(k_p, input_dim, output_dim)

    out = feature_aggregation_layer(x, params)
    out = jax.block_until_ready(out)

    ref = reference_forward(x, params)
    assert out.shape == (batch, seq, output_dim)
    assert jnp.allclose(out, ref, atol=1e-4, rtol=1e-4), "mismatch vs reference"

    print("KERNEL_OK")
</pallas_src>

<mosaic_0001>
module attributes {stable_mosaic.version = 11 : i64} {
  func.func @_fal_kernel(%arg0: i32, %arg1: memref<128x128xf32, #tpu.memory_space<vmem>>, %arg2: memref<128x128xf32, #tpu.memory_space<vmem>>, %arg3: memref<128x256xf32, #tpu.memory_space<vmem>>, %arg4: memref<5x128xf32, #tpu.memory_space<vmem>>, %arg5: memref<128x128xf32, #tpu.memory_space<vmem>>) attributes {dimension_semantics = [#tpu.dimension_semantics<parallel>], iteration_bounds = array<i64: 1>, scalar_prefetch = 0 : i64, scratch_operands = 0 : i64, tpu.core_type = #tpu.core_type<tc>, window_params = [{transform_indices = @transform_0, window_bounds = array<i64: 128, 128>}, {pipeline_mode = #tpu.pipeline_mode<synchronous>, transform_indices = @transform_1, window_bounds = array<i64: 128, 128>}, {pipeline_mode = #tpu.pipeline_mode<synchronous>, transform_indices = @transform_2, window_bounds = array<i64: 128, 256>}, {pipeline_mode = #tpu.pipeline_mode<synchronous>, transform_indices = @transform_3, window_bounds = array<i64: 5, 128>}, {transform_indices = @transform_4, window_bounds = array<i64: 128, 128>}]} {
    %c0 = arith.constant 0 : index
    %c0_0 = arith.constant 0 : index
    %0 = vector.load %arg4[%c0, %c0_0] : memref<5x128xf32, #tpu.memory_space<vmem>>, vector<5x128xf32>
    %c0_1 = arith.constant 0 : index
    %c0_2 = arith.constant 0 : index
    %1 = vector.load %arg1[%c0_1, %c0_2] : memref<128x128xf32, #tpu.memory_space<vmem>>, vector<128x128xf32>
    %c0_3 = arith.constant 0 : index
    %c0_4 = arith.constant 0 : index
    %2 = vector.load %arg2[%c0_3, %c0_4] : memref<128x128xf32, #tpu.memory_space<vmem>>, vector<128x128xf32>
    %cst = arith.constant dense<0.000000e+00> : vector<128x128xf32>
    %3 = tpu.matmul %1, %2, %cst {dimension_numbers = #tpu.dot_dimension_numbers<[1], [0], [0], [1], [0, 0, 1, 1], [], []>} : vector<128x128xf32>, vector<128x128xf32>, vector<128x128xf32> -> vector<128x128xf32>
    %4 = vector.extract_strided_slice %0 {offsets = [0, 0], sizes = [1, 128], strides = [1, 1]} : vector<5x128xf32> to vector<1x128xf32>
    %5 = vector.broadcast %4 : vector<1x128xf32> to vector<128x128xf32>
    %6 = arith.addf %3, %5 : vector<128x128xf32>
    %c0_5 = arith.constant 0 : index
    %c0_6 = arith.constant 0 : index
    %7 = vector.load %arg3[%c0_5, %c0_6] : memref<128x256xf32, #tpu.memory_space<vmem>>, vector<128x256xf32>
    %cst_7 = arith.constant dense<0.000000e+00> : vector<128x256xf32>
    %8 = tpu.matmul %6, %7, %cst_7 {dimension_numbers = #tpu.dot_dimension_numbers<[1], [0], [0], [1], [0, 0, 1, 1], [], []>} : vector<128x128xf32>, vector<128x256xf32>, vector<128x256xf32> -> vector<128x256xf32>
    %9 = vector.extract_strided_slice %8 {offsets = [0, 128], sizes = [128, 128], strides = [1, 1]} : vector<128x256xf32> to vector<128x128xf32>
    %10 = vector.extract_strided_slice %0 {offsets = [2, 0], sizes = [1, 128], strides = [1, 1]} : vector<5x128xf32> to vector<1x128xf32>
    %11 = vector.broadcast %10 : vector<1x128xf32> to vector<128x128xf32>
    %12 = arith.addf %9, %11 : vector<128x128xf32>
    %13 = arith.negf %12 : vector<128x128xf32>
    %14 = math.exp %13 : vector<128x128xf32>
    %cst_8 = arith.constant 1.000000e+00 : f32
    %15 = vector.broadcast %cst_8 : f32 to vector<128x128xf32>
    %16 = arith.addf %15, %14 : vector<128x128xf32>
    %17 = arith.divf %15, %16 : vector<128x128xf32>
    %18 = arith.mulf %17, %6 : vector<128x128xf32>
    %cst_9 = arith.constant 1.000000e+00 : f32
    %19 = vector.broadcast %cst_9 : f32 to vector<128x128xf32>
    %20 = arith.subf %19, %17 : vector<128x128xf32>
    %21 = vector.extract_strided_slice %8 {offsets = [0, 0], sizes = [128, 128], strides = [1, 1]} : vector<128x256xf32> to vector<128x128xf32>
    %22 = vector.extract_strided_slice %0 {offsets = [1, 0], sizes = [1, 128], strides = [1, 1]} : vector<5x128xf32> to vector<1x128xf32>
    %23 = vector.broadcast %22 : vector<1x128xf32> to vector<128x128xf32>
    %24 = arith.addf %21, %23 : vector<128x128xf32>
    %25 = math.tanh %24 : vector<128x128xf32>
    %26 = arith.mulf %20, %25 : vector<128x128xf32>
    %27 = arith.addf %18, %26 : vector<128x128xf32>
    %28 = vector.extract_strided_slice %0 {offsets = [3, 0], sizes = [1, 128], strides = [1, 1]} : vector<5x128xf32> to vector<1x128xf32>
    %29 = vector.broadcast %28 : vector<1x128xf32> to vector<128x128xf32>
    %30 = arith.mulf %27, %29 : vector<128x128xf32>
    %31 = vector.extract_strided_slice %0 {offsets = [4, 0], sizes = [1, 128], strides = [1, 1]} : vector<5x128xf32> to vector<1x128xf32>
    %32 = vector.broadcast %31 : vector<1x128xf32> to vector<128x128xf32>
    %33 = arith.addf %30, %32 : vector<128x128xf32>
    %c0_10 = arith.constant 0 : index
    %c0_11 = arith.constant 0 : index
    %34 = vector.load %arg5[%c0_10, %c0_11] : memref<128x128xf32, #tpu.memory_space<vmem>>, vector<128x128xf32>
    tpu.vector_store %arg5[%c0_10, %c0_11], %33 {strides = array<i32>} : memref<128x128xf32, #tpu.memory_space<vmem>>, vector<128x128xf32>,
    return
  }
  func.func @transform_0(%arg0: i32) -> (i32, i32) {
    %c0_i32 = arith.constant 0 : i32
    %c0_i32_0 = arith.constant 0 : i32
    return %arg0, %c0_i32 : i32, i32
  }
  func.func @transform_1(%arg0: i32) -> (i32, i32) {
    %c0_i32 = arith.constant 0 : i32
    %c0_i32_0 = arith.constant 0 : i32
    %c0_i32_1 = arith.constant 0 : i32
    return %c0_i32, %c0_i32_0 : i32, i32
  }
  func.func @transform_2(%arg0: i32) -> (i32, i32) {
    %c0_i32 = arith.constant 0 : i32
    %c0_i32_0 = arith.constant 0 : i32
    %c0_i32_1 = arith.constant 0 : i32
    return %c0_i32, %c0_i32_0 : i32, i32
  }
  func.func @transform_3(%arg0: i32) -> (i32, i32) {
    %c0_i32 = arith.constant 0 : i32
    %c0_i32_0 = arith.constant 0 : i32
    %c0_i32_1 = arith.constant 0 : i32
    return %c0_i32, %c0_i32_0 : i32, i32
  }
  func.func @transform_4(%arg0: i32) -> (i32, i32) {
    %c0_i32 = arith.constant 0 : i32
    %c0_i32_0 = arith.constant 0 : i32
    return %arg0, %c0_i32 : i32, i32
  }
}

</mosaic_0001>

<bundles_post_ra>
// kernel: tile.40
= control target key start
LH: loop header
LB: loop body
LE: loop exit
PB: predicated region body
PF: predicated region fallthrough
CT: control target
= control target key end

     0   :  { %s22_s0 = inlined_call_operand.vmem [shape: f32[32], index: 0, kind: input, shape index: {}]   ;;  %s23_s1 = inlined_call_operand.vmem [shape: f32[4,32], index: 1, kind: output, shape index: {}]  }
   0x1   :  { %v4_v0 = vld [vmem:[%s22_s0] ss:$0 sm:$0xff] }
   0x2   :  { %5 = vst [vmem:[%s23_s1] sm:$0xf] %v4_v0 }

// kernel: tile.48
= control target key start
LH: loop header
LB: loop body
LE: loop exit
PB: predicated region body
PF: predicated region fallthrough
CT: control target
= control target key end

     0   :  { %vm8_vm0 = vcmask 261120   ;;  %s40_s8 = smov 32   ;;  %s41_s9 = smov 64   ;;  %vm14_vm1 = vcmask 1048320   ;;  %vm20_vm2 = vcmask 785920   ;;  %vm26_vm3 = vcmask 523520   ;;  %s58_s0 = inlined_call_operand.vmem [shape: f32[4,32], index: 0, kind: input, shape index: {}]   ;;  %s59_s1 = inlined_call_operand.vmem [shape: f32[1,128], index: 1, kind: output, shape index: {}]  }
   0x1   :  { %v5_v0 = vld [vmem:[%s58_s0] sm:$0xf]  ;;  %s39_s0 = smov 96  }
   0x2   :  { %6 = vst [vmem:[#allocation1] sm:$0xf] %v5_v0 }
   0x9   :  { %v11_v1 = vld [vmem:[#allocation1 + $0x3] sm:$0x1]   ;;  %v23_v2 = vld [vmem:[#allocation1 + $0x1] sm:$0x1]   ;;  %v7_v3 = vld [vmem:[#allocation1] sm:$0x1]  }
   0xa   :  { %12 = vrot.lane.b32.xlu0 %v11_v1, %s39_s0  ;;  %24 = vrot.lane.b32.xlu1 %v23_v2, %s40_s8  ;;  %v17_v4 = vld [vmem:[#allocation1 + $0x2] sm:$0x1]   ;;  %9 = vst.msk [vmem:[#allocation0] sm:$0x1] %vm8_vm0, %v7_v3  }
   0xe   :  { %18 = vrot.lane.b32.xlu0 %v17_v4, %s41_s9 }
  0x7c   :  { %v13_v5 = vpop.permute.xlu0 %12   ;;  %v25_v6 = vpop.permute.xlu1 %24  }
  0x7d   :  { %15 = vst.msk [vmem:[#allocation0] sm:$0x1] %vm14_vm1, %v13_v5  }
  0x80   :  { %v19_v7 = vpop.permute.xlu0 %18  }
  0x81   :  { %21 = vst.msk [vmem:[#allocation0] sm:$0x1] %vm20_vm2, %v19_v7  }
  0x82   :  { %27 = vst.msk [vmem:[#allocation0] sm:$0x1] %vm26_vm3, %v25_v6  }
  0x89   :  { %v32_v8 = vld [vmem:[#allocation0] sm:$0x1] }
  0x8a   :  { %35 = vst [vmem:[%s59_s1] sm:$0x1] %v32_v8 }

// kernel: feature_aggregation_layer.1
= control target key start
LH: loop header
LB: loop body
LE: loop exit
PB: predicated region body
PF: predicated region fallthrough
CT: control target
= control target key end

     0   :  { %s1432_s1 = inlined_call_operand.vmem [shape: f32[128,128], index: 1, kind: input, shape index: {}]   ;;  %s1433_s0 = inlined_call_operand.vmem [shape: f32[128,128], index: 0, kind: input, shape index: {}]   ;;  %s1434_s2 = inlined_call_operand.vmem [shape: f32[128,256], index: 2, kind: input, shape index: {}]   ;;  %s1435_s3 = inlined_call_operand.vmem [shape: f32[5,128], index: 3, kind: input, shape index: {}]   ;;  %s1436_s4 = inlined_call_operand.vmem [shape: f32[128,128], index: 4, kind: output, shape index: {}]  }
   0x1   :  { %v49_v0 = vld [vmem:[%s1432_s1 + $0x78] sm:$0xff]  ;;  %v48_v1 = vld [vmem:[%s1432_s1 + $0x70] sm:$0xff]  ;;  %v47_v2 = vld [vmem:[%s1432_s1 + $0x68] sm:$0xff] }
   0x2   :  { %716 = vmatprep.subr.mxu0 %v49_v0  ;;  %v46_v3 = vld [vmem:[%s1432_s1 + $0x60] sm:$0xff]  ;;  %v45_v5 = vld [vmem:[%s1432_s1 + $0x58] sm:$0xff]  ;;  %v44_v6 = vld [vmem:[%s1432_s1 + $0x50] sm:$0xff] }
   0x3   :  { %717 = vmatpush3.msra.mxu0 %v49_v0  ;;  %v18_v4 = vld [vmem:[%s1433_s0] sm:$0xff]  ;;  %v43_v7 = vld [vmem:[%s1432_s1 + $0x48] sm:$0xff]  ;;  %v954_v8 = vld [vmem:[%s1434_s2 + $0xf8] sm:$0xff]  ;;  %v901_v0 = vmov 0.0  }
   0x4   :  { %718 = vmatprep.subr.mxu0 %v48_v1  ;;  %748 = vmatprep.mubr.f32.mxu0 %v18_v4  ;;  %v959_v9 = vld [vmem:[%s1434_s2 + $0xf0] sm:$0xff]  ;;  %v42_v10 = vld [vmem:[%s1432_s1 + $0x40] sm:$0xff]  ;;  %v968_v11 = vld [vmem:[%s1434_s2 + $0xe8] sm:$0xff] }
   0x5   :  { %719 = vmatpush3.msra.mxu0 %v48_v1  ;;  %772 = vmatprep.subr.mxu1 %v954_v8  ;;  %v974_v12 = vld [vmem:[%s1434_s2 + $0xe0] sm:$0xff]  ;;  %v41_v13 = vld [vmem:[%s1432_s1 + $0x38] sm:$0xff]  ;;  %v989_v15 = vld [vmem:[%s1434_s2 + $0xd0] sm:$0xff]  ;;  %v50_v1 = vlaneseq }
   0x6   :  { %720 = vmatprep.subr.mxu0 %v47_v2  ;;  %788 = vmatpush1.msra.mxu1 %v959_v9  ;;  %v983_v14 = vld [vmem:[%s1434_s2 + $0xd8] sm:$0xff]  ;;  %v40_v16 = vld [vmem:[%s1432_s1 + $0x30] sm:$0xff]  ;;  %v998_v17 = vld [vmem:[%s1434_s2 + $0xc8] sm:$0xff] }
   0x7   :  { %721 = vmatpush3.msra.mxu0 %v47_v2  ;;  %773 = vmatprep.subr.mxu1 %v968_v11  ;;  %v1004_v18 = vld [vmem:[%s1434_s2 + $0xc0] sm:$0xff]  ;;  %v39_v19 = vld [vmem:[%s1432_s1 + $0x28] sm:$0xff]  ;;  %v1013_v20 = vld [vmem:[%s1434_s2 + $0xb8] sm:$0xff]  ;;  %v1193_v2 = vshrl.u32 %v50_v1, 7 }
   0x8   :  { %722 = vmatprep.subr.mxu0 %v46_v3  ;;  %789 = vmatpush1.msra.mxu1 %v974_v12  ;;  %v1019_v21 = vld [vmem:[%s1434_s2 + $0xb0] sm:$0xff]  ;;  %v38_v22 = vld [vmem:[%s1432_s1 + $0x20] sm:$0xff]  ;;  %v1028_v23 = vld [vmem:[%s1434_s2 + $0xa8] sm:$0xff] }
   0x9   :  { %723 = vmatpush3.msra.mxu0 %v46_v3  ;;  %774 = vmatprep.subr.mxu1 %v983_v14  ;;  %v1034_v24 = vld [vmem:[%s1434_s2 + $0xa0] sm:$0xff]  ;;  %v37_v25 = vld [vmem:[%s1432_s1 + $0x18] sm:$0xff]  ;;  %v1049_v27 = vld [vmem:[%s1434_s2 + $0x90] sm:$0xff]  ;;  %v52_v3 = vsub.s32 0, %v1193_v2 }
   0xa   :  { %724 = vmatprep.subr.mxu0 %v45_v5  ;;  %790 = vmatpush1.msra.mxu1 %v989_v15  ;;  %v1043_v26 = vld [vmem:[%s1434_s2 + $0x98] sm:$0xff]  ;;  %v36_v28 = vld [vmem:[%s1432_s1 + $0x10] sm:$0xff]  ;;  %v1058_v29 = vld [vmem:[%s1434_s2 + $0x88] sm:$0xff] }
   0xb   :  { %725 = vmatpush3.msra.mxu0 %v45_v5  ;;  %775 = vmatprep.subr.mxu1 %v998_v17  ;;  %v1064_v30 = vld [vmem:[%s1434_s2 + $0x80] sm:$0xff]  ;;  %v35_v31 = vld [vmem:[%s1432_s1 + $0x8] sm:$0xff]  ;;  %v1073_v32 = vld [vmem:[%s1434_s2 + $0x78] sm:$0xff] }
   0xc   :  { %726 = vmatprep.subr.mxu0 %v44_v6  ;;  %791 = vmatpush1.msra.mxu1 %v1004_v18  ;;  %v1079_v33 = vld [vmem:[%s1434_s2 + $0x70] sm:$0xff]  ;;  %v34_v34 = vld [vmem:[%s1432_s1] sm:$0xff]  ;;  %v212_v35 = vld [vmem:[%s1434_s2 + $0x68] sm:$0xff] }
   0xd   :  { %727 = vmatpush3.msra.mxu0 %v44_v6  ;;  %776 = vmatprep.subr.mxu1 %v1013_v20  ;;  %v211_v36 = vld [vmem:[%s1434_s2 + $0x60] sm:$0xff]  ;;  %v19_v37 = vld [vmem:[%s1433_s0 + $0x8] sm:$0xff]  ;;  %v210_v38 = vld [vmem:[%s1434_s2 + $0x58] sm:$0xff] }
   0xe   :  { %728 = vmatprep.subr.mxu0 %v43_v7  ;;  %792 = vmatpush1.msra.mxu1 %v1019_v21  ;;  %v20_v39 = vld [vmem:[%s1433_s0 + $0x10] sm:$0xff]  ;;  %v21_v41 = vld [vmem:[%s1433_s0 + $0x18] sm:$0xff]  ;;  %v208_v42 = vld [vmem:[%s1434_s2 + $0x48] sm:$0xff] }
   0xf   :  { %729 = vmatpush3.msra.mxu0 %v43_v7  ;;  %777 = vmatprep.subr.mxu1 %v1028_v23  ;;  %v209_v40 = vld [vmem:[%s1434_s2 + $0x50] sm:$0xff]  ;;  %v22_v43 = vld [vmem:[%s1433_s0 + $0x20] sm:$0xff]  ;;  %v23_v45 = vld [vmem:[%s1433_s0 + $0x28] sm:$0xff] }
  0x10   :  { %730 = vmatprep.subr.mxu0 %v42_v10  ;;  %793 = vmatpush1.msra.mxu1 %v1034_v24  ;;  %v207_v44 = vld [vmem:[%s1434_s2 + $0x40] sm:$0xff]  ;;  %v206_v46 = vld [vmem:[%s1434_s2 + $0x38] sm:$0xff]  ;;  %v24_v47 = vld [vmem:[%s1433_s0 + $0x30] sm:$0xff] }
  0x11   :  { %731 = vmatpush3.msra.mxu0 %v42_v10  ;;  %778 = vmatprep.subr.mxu1 %v1043_v26  ;;  %v205_v48 = vld [vmem:[%s1434_s2 + $0x30] sm:$0xff]  ;;  %v25_v49 = vld [vmem:[%s1433_s0 + $0x38] sm:$0xff]  ;;  %v204_v50 = vld [vmem:[%s1434_s2 + $0x28] sm:$0xff] }
  0x12   :  { %732 = vmatprep.subr.mxu0 %v41_v13  ;;  %794 = vmatpush1.msra.mxu1 %v1049_v27  ;;  %v26_v51 = vld [vmem:[%s1433_s0 + $0x40] sm:$0xff]  ;;  %v27_v52 = vld [vmem:[%s1433_s0 + $0x48] sm:$0xff]  ;;  %v28_v53 = vld [vmem:[%s1433_s0 + $0x50] sm:$0xff] }
  0x13   :  { %733 = vmatpush3.msra.mxu0 %v41_v13  ;;  %779 = vmatprep.subr.mxu1 %v1058_v29  ;;  %v29_v54 = vld [vmem:[%s1433_s0 + $0x58] sm:$0xff]  ;;  %v30_v55 = vld [vmem:[%s1433_s0 + $0x60] sm:$0xff]  ;;  %v31_v56 = vld [vmem:[%s1433_s0 + $0x68] sm:$0xff] }
  0x14   :  { %734 = vmatprep.subr.mxu0 %v40_v16  ;;  %795 = vmatpush1.msra.mxu1 %v1064_v30  ;;  %v32_v57 = vld [vmem:[%s1433_s0 + $0x70] sm:$0xff]  ;;  %v33_v58 = vld [vmem:[%s1433_s0 + $0x78] sm:$0xff]  ;;  %v203_v59 = vld [vmem:[%s1434_s2 + $0x20] sm:$0xff] }
  0x15   :  { %735 = vmatpush3.msra.mxu0 %v40_v16  ;;  %780 = vmatprep.subr.mxu1 %v1073_v32  ;;  %v202_v60 = vld [vmem:[%s1434_s2 + $0x18] sm:$0xff]  ;;  %v201_v61 = vld [vmem:[%s1434_s2 + $0x10] sm:$0xff]  ;;  %v200_v62 = vld [vmem:[%s1434_s2 + $0x8] sm:$0xff] }
  0x16   :  { %736 = vmatprep.subr.mxu0 %v39_v19  ;;  %796 = vmatpush1.msra.mxu1 %v1079_v33  ;;  %v199_v63 = vld [vmem:[%s1434_s2] sm:$0xff] }
  0x17   :  { %737 = vmatpush3.msra.mxu0 %v39_v19  ;;  %781 = vmatprep.subr.mxu1 %v212_v35  ;;  %v1199_v4 = vld [vmem:[%s1435_s3] sm:$0x1f] }
  0x18   :  { %738 = vmatprep.subr.mxu0 %v38_v22  ;;  %797 = vmatpush1.msra.mxu1 %v211_v36  ;;  %v53_v6 = vrot.slane %v1199_v4, %v52_v3 }
  0x19   :  { %739 = vmatpush3.msra.mxu0 %v38_v22  ;;  %782 = vmatprep.subr.mxu1 %v210_v38 }
  0x1a   :  { %740 = vmatprep.subr.mxu0 %v37_v25  ;;  %798 = vmatpush1.msra.mxu1 %v209_v40 }
  0x1b   :  { %741 = vmatpush3.msra.mxu0 %v37_v25  ;;  %783 = vmatprep.subr.mxu1 %v208_v42 }
  0x1c   :  { %742 = vmatprep.subr.mxu0 %v36_v28  ;;  %799 = vmatpush1.msra.mxu1 %v207_v44 }
  0x1d   :  { %743 = vmatpush3.msra.mxu0 %v36_v28  ;;  %784 = vmatprep.subr.mxu1 %v206_v46 }
  0x1e   :  { %744 = vmatprep.subr.mxu0 %v35_v31  ;;  %800 = vmatpush1.msra.mxu1 %v205_v48 }
  0x1f   :  { %745 = vmatpush3.msra.mxu0 %v35_v31  ;;  %785 = vmatprep.subr.mxu1 %v204_v50 }
  0x20   :  { %746 = vmatprep.subr.mxu0 %v34_v34  ;;  %801 = vmatpush1.msra.mxu1 %v203_v59 }
  0x21   :  { %747 = vmatpush3.msra.mxu0 %v34_v34  ;;  %786 = vmatprep.subr.mxu1 %v202_v60 }
  0x22   :  { %749 = vmatmul.mubr.f32.vlgmr.msra.gmra.mxu0 %v19_v37  ;;  %231 = vmatprep.subr.mxu0 %v954_v8 }
  0x23   :  { %751 = vmatprep.mubr.f32.mxu0 %v20_v39  ;;  %232 = vmatpush1.msra.mxu0 %v959_v9 }
  0x24   :  { %233 = vmatprep.subr.mxu0 %v968_v11  ;;  %802 = vmatpush1.msra.mxu1 %v201_v61 }
  0x25   :  { %234 = vmatpush1.msra.mxu0 %v974_v12  ;;  %787 = vmatprep.subr.mxu1 %v200_v62 }
  0x26   :  { %752 = vmatmul.mubr.f32.gmra.mxu0 %v21_v41  ;;  %235 = vmatprep.subr.mxu0 %v983_v14 }
  0x27   :  { %754 = vmatprep.mubr.f32.mxu0 %v22_v43  ;;  %236 = vmatpush1.msra.mxu0 %v989_v15 }
  0x28   :  { %237 = vmatprep.subr.mxu0 %v998_v17  ;;  %803 = vmatpush1.msra.mxu1 %v199_v63 }
  0x29   :  { %238 = vmatpush1.msra.mxu0 %v1004_v18  ;;  %319 = vmatprep.mubr.f32.mxu1 %v901_v0 }
  0x2a   :  { %755 = vmatmul.mubr.f32.gmra.mxu0 %v23_v45  ;;  %239 = vmatprep.subr.mxu0 %v1013_v20 }
  0x2b   :  { %757 = vmatprep.mubr.f32.mxu0 %v24_v47  ;;  %240 = vmatpush1.msra.mxu0 %v1019_v21 }
  0x2c   :  { %241 = vmatprep.subr.mxu0 %v1028_v23 }
  0x2d   :  { %242 = vmatpush1.msra.mxu0 %v1034_v24 }
  0x2e   :  { %758 = vmatmul.mubr.f32.gmra.mxu0 %v25_v49  ;;  %243 = vmatprep.subr.mxu0 %v1043_v26 }
  0x2f   :  { %760 = vmatprep.mubr.f32.mxu0 %v26_v51  ;;  %244 = vmatpush1.msra.mxu0 %v1049_v27 }
  0x30   :  { %245 = vmatprep.subr.mxu0 %v1058_v29 }
  0x31   :  { %246 = vmatpush1.msra.mxu0 %v1064_v30 }
  0x32   :  { %761 = vmatmul.mubr.f32.gmra.mxu0 %v27_v52  ;;  %247 = vmatprep.subr.mxu0 %v1073_v32 }
  0x33   :  { %763 = vmatprep.mubr.f32.mxu0 %v28_v53  ;;  %248 = vmatpush1.msra.mxu0 %v1079_v33 }
  0x34   :  { %249 = vmatprep.subr.mxu0 %v212_v35 }
  0x35   :  { %250 = vmatpush1.msra.mxu0 %v211_v36 }
  0x36   :  { %764 = vmatmul.mubr.f32.gmra.mxu0 %v29_v54  ;;  %251 = vmatprep.subr.mxu0 %v210_v38  ;;  %v394_v38 = vsub.s32 2, %v1193_v2 }
  0x37   :  { %766 = vmatprep.mubr.f32.mxu0 %v30_v55  ;;  %252 = vmatpush1.msra.mxu0 %v209_v40 }
  0x38   :  { %253 = vmatprep.subr.mxu0 %v208_v42  ;;  %v1266_v39 = vrot.slane %v1199_v4, %v394_v38 }
  0x39   :  { %254 = vmatpush1.msra.mxu0 %v207_v44 }
  0x3a   :  { %767 = vmatmul.mubr.f32.gmra.mxu0 %v31_v56  ;;  %255 = vmatprep.subr.mxu0 %v206_v46  ;;  %v542_v56 = vsub.s32 1, %v1193_v2 }
  0x3b   :  { %769 = vmatprep.mubr.f32.mxu0 %v32_v57  ;;  %256 = vmatpush1.msra.mxu0 %v205_v48 }
  0x3c   :  { %257 = vmatprep.subr.mxu0 %v204_v50 }
  0x3d   :  { %258 = vmatpush1.msra.mxu0 %v203_v59 }
  0x3e   :  { %770 = vmatmul.mubr.f32.gmra.mxu0 %v33_v58  ;;  %259 = vmatprep.subr.mxu0 %v202_v60 }
  0x3f   :  { %260 = vmatpush1.msra.mxu0 %v201_v61  ;;  %295 = vmatprep.mubr.f32.mxu0 %v901_v0 }
  0x40   :  { %261 = vmatprep.subr.mxu0 %v200_v62 }
  0x41   :  { %262 = vmatpush1.msra.mxu0 %v199_v63 }
  0xe2   :  { %v750_v5 = vpop.f32.mrf.mxu0 }
  0xe3   :  { %v1206_v11 = vadd.f32 %v750_v5, %v53_v6 }
  0xe4   :  { %v120_v7 = vpop.f32.mrf.mxu0 }
  0xe5   :  { %v1202_v8 = vadd.f32 %v120_v7, %v53_v6 }
  0xe6   :  { %v753_v9 = vpop.f32.mrf.mxu0 }
  0xe7   :  { %296 = vmatmul.mubr.f32.vlgmr.msra.gmra.mxu0 %v1202_v8  ;;  %v1218_v17 = vadd.f32 %v753_v9, %v53_v6 }
  0xe8   :  { %v130_v10 = vpop.f32.mrf.mxu0  ;;  %301 = vmatprep.mubr.f32.mxu0 %v901_v0 }
  0xe9   :  { %v1210_v14 = vadd.f32 %v130_v10, %v53_v6 }
  0xea   :  { %v756_v12 = vpop.f32.mrf.mxu0 }
  0xeb   :  { %302 = vmatmul.mubr.f32.gmra.mxu0 %v1206_v11  ;;  %v1220_v18 = vadd.f32 %v756_v12, %v53_v6 }
  0xec   :  { %v140_v13 = vpop.f32.mrf.mxu0  ;;  %307 = vmatprep.mubr.f32.mxu0 %v901_v0 }
  0xed   :  { %v1212_v15 = vadd.f32 %v140_v13, %v53_v6 }
  0xee   :  { %v759_v16 = vpop.f32.mrf.mxu0 }
  0xef   :  { %308 = vmatmul.mubr.f32.gmra.mxu0 %v1210_v14  ;;  %320 = vmatmul.mubr.f32.vlgmr.msra.gmra.mxu1 %v1212_v15  ;;  %v1229_v22 = vadd.f32 %v759_v16, %v53_v6 }
  0xf0   :  { %313 = vmatprep.mubr.f32.mxu0 %v901_v0  ;;  %325 = vmatprep.mubr.f32.mxu1 %v901_v0  ;;  %v150_v19 = vpop.f32.mrf.mxu0 }
  0xf1   :  { %v1225_v20 = vadd.f32 %v150_v19, %v53_v6 }
  0xf2   :  { %v762_v21 = vpop.f32.mrf.mxu0 }
  0xf3   :  { %314 = vmatmul.mubr.f32.gmra.mxu0 %v1218_v17  ;;  %326 = vmatmul.mubr.f32.gmra.mxu1 %v1220_v18  ;;  %v1237_v26 = vadd.f32 %v762_v21, %v53_v6 }
  0xf4   :  { %331 = vmatprep.mubr.f32.mxu1 %v901_v0  ;;  %v160_v23 = vpop.f32.mrf.mxu0 }
  0xf5   :  { %v1233_v24 = vadd.f32 %v160_v23, %v53_v6 }
  0xf6   :  { %v765_v25 = vpop.f32.mrf.mxu0 }
  0xf7   :  { %332 = vmatmul.mubr.f32.gmra.mxu1 %v1225_v20  ;;  %v1245_v30 = vadd.f32 %v765_v25, %v53_v6 }
  0xf8   :  { %337 = vmatprep.mubr.f32.mxu1 %v901_v0  ;;  %v170_v27 = vpop.f32.mrf.mxu0 }
  0xf9   :  { %v1241_v28 = vadd.f32 %v170_v27, %v53_v6 }
  0xfa   :  { %v768_v29 = vpop.f32.mrf.mxu0 }
  0xfb   :  { %338 = vmatmul.mubr.f32.gmra.mxu1 %v1229_v22  ;;  %v1253_v34 = vadd.f32 %v768_v29, %v53_v6 }
  0xfc   :  { %343 = vmatprep.mubr.f32.mxu1 %v901_v0  ;;  %v180_v31 = vpop.f32.mrf.mxu0 }
  0xfd   :  { %v1249_v32 = vadd.f32 %v180_v31, %v53_v6 }
  0xfe   :  { %v771_v33 = vpop.f32.mrf.mxu0 }
  0xff   :  { %344 = vmatmul.mubr.f32.gmra.mxu1 %v1233_v24  ;;  %v1261_v37 = vadd.f32 %v771_v33, %v53_v6 }
 0x100   :  { %349 = vmatprep.mubr.f32.mxu1 %v901_v0  ;;  %v190_v35 = vpop.f32.mrf.mxu0 }
 0x101   :  { %v1257_v36 = vadd.f32 %v190_v35, %v53_v6 }
 0x103   :  { %350 = vmatmul.mubr.f32.gmra.mxu1 %v1237_v26 }
 0x104   :  { %355 = vmatprep.mubr.f32.mxu1 %v901_v0 }
 0x107   :  { %356 = vmatmul.mubr.f32.gmra.mxu1 %v1241_v28 }
 0x108   :  { %361 = vmatprep.mubr.f32.mxu1 %v901_v0 }
 0x10b   :  { %362 = vmatmul.mubr.f32.gmra.mxu1 %v1245_v30 }
 0x10c   :  { %367 = vmatprep.mubr.f32.mxu1 %v901_v0 }
 0x10f   :  { %368 = vmatmul.mubr.f32.gmra.mxu1 %v1249_v32 }
 0x110   :  { %373 = vmatprep.mubr.f32.mxu1 %v901_v0 }
 0x113   :  { %374 = vmatmul.mubr.f32.gmra.mxu1 %v1253_v34 }
 0x114   :  { %379 = vmatprep.mubr.f32.mxu1 %v901_v0 }
 0x117   :  { %380 = vmatmul.mubr.f32.gmra.mxu1 %v1257_v36 }
 0x118   :  { %385 = vmatprep.mubr.f32.mxu1 %v901_v0  ;;  %v1276_v0 = vrot.slane %v1199_v4, %v542_v56  ;;  %v610_v56 = vsub.s32 3, %v1193_v2 }
 0x11b   :  { %386 = vmatmul.mubr.f32.gmra.mxu1 %v1261_v37 }
 0x1a7   :  { %v297_v40 = vpop.f32.mrf.mxu0 }
 0x1a8   :  { %v544_v10 = vadd.f32 %v1276_v0, %v297_v40 }
 0x1a9   :  { %v299_v41 = vpop.f32.mrf.mxu0 }
 0x1aa   :  { %v396_v42 = vadd.f32 %v1266_v39, %v299_v41 }
 0x1ab   :  { %v303_v43 = vpop.f32.mrf.mxu0 }
 0x1ac   :  { %v668_v44 = vmul.f32 -1.442695, %v396_v42  ;;  %v545_v16 = vadd.f32 %v1276_v0, %v303_v43 }
 0x1ad   :  { %v305_v45 = vpop.f32.mrf.mxu0 }
 0x1ae   :  { %805 = vpow2.f32 %v668_v44  ;;  %v397_v46 = vadd.f32 %v1266_v39, %v305_v45 }
 0x1af   :  { %v309_v47 = vpop.f32.mrf.mxu0  ;;  %v321_v48 = vpop.f32.mrf.mxu1 }
 0x1b0   :  { %v669_v49 = vmul.f32 -1.442695, %v397_v46  ;;  %v546_v29 = vadd.f32 %v1276_v0, %v309_v47  ;;  %v548_v33 = vadd.f32 %v1276_v0, %v321_v48 }
 0x1b1   :  { %v311_v50 = vpop.f32.mrf.mxu0  ;;  %v323_v51 = vpop.f32.mrf.mxu1 }
 0x1b2   :  { %807 = vpow2.f32 %v669_v49  ;;  %v398_v52 = vadd.f32 %v1266_v39, %v311_v50  ;;  %v400_v53 = vadd.f32 %v1266_v39, %v323_v51 }
 0x1b3   :  { %v315_v54 = vpop.f32.mrf.mxu0  ;;  %v327_v55 = vpop.f32.mrf.mxu1 }
 0x1b4   :  { %v670_v57 = vmul.f32 -1.442695, %v398_v52  ;;  %v672_v58 = vmul.f32 -1.442695, %v400_v53  ;;  %v547_v46 = vadd.f32 %v1276_v0, %v315_v54 }
 0x1b5   :  { %v317_v59 = vpop.f32.mrf.mxu0  ;;  %v329_v60 = vpop.f32.mrf.mxu1 }
 0x1b6   :  { %809 = vpow2.f32 %v670_v57  ;;  %v399_v61 = vadd.f32 %v1266_v39, %v317_v59  ;;  %v401_v62 = vadd.f32 %v1266_v39, %v329_v60  ;;  %v549_v57 = vadd.f32 %v1276_v0, %v327_v55 }
 0x1b7   :  { %811 = vpow2.f32 %v672_v58  ;;  %v333_v63 = vpop.f32.mrf.mxu1  ;;  %v1301_v55 = vrot.slane %v1199_v4, %v610_v56 }
 0x1b8   :  { %v671_v1 = vmul.f32 -1.442695, %v399_v61  ;;  %v673_v3 = vmul.f32 -1.442695, %v401_v62  ;;  %v630_v61 = vsub.s32 4, %v1193_v2 }
 0x1b9   :  { %v335_v5 = vpop.f32.mrf.mxu1 }
 0x1ba   :  { %813 = vpow2.f32 %v671_v1  ;;  %v402_v6 = vadd.f32 %v1266_v39, %v335_v5  ;;  %v550_v5 = vadd.f32 %v1276_v0, %v333_v63  ;;  %v1307_v63 = vrot.slane %v1199_v4, %v630_v61 }
 0x1bb   :  { %v806_v7 = vpop.eup %805  ;;  %815 = vpow2.f32 %v673_v3  ;;  %v339_v9 = vpop.f32.mrf.mxu1 }
 0x1bc   :  { %v460_v12 = vadd.f32 1.0, %v806_v7  ;;  %v674_v13 = vmul.f32 -1.442695, %v402_v6 }
 0x1bd   :  { %v341_v19 = vpop.f32.mrf.mxu1 }
 0x1be   :  { %817 = vrcp.f32 %v460_v12  ;;  %v403_v21 = vadd.f32 %v1266_v39, %v341_v19  ;;  %v551_v12 = vadd.f32 %v1276_v0, %v339_v9 }
 0x1bf   :  { %v808_v23 = vpop.eup %807  ;;  %819 = vpow2.f32 %v674_v13  ;;  %v1282_v25 = vpop.f32.mrf.mxu1 }
 0x1c0   :  { %821 = vtanh.f32 %v544_v10  ;;  %v461_v27 = vadd.f32 1.0, %v808_v23  ;;  %v675_v31 = vmul.f32 -1.442695, %v403_v21  ;;  %v552_v9 = vadd.f32 %v1276_v0, %v1282_v25 }
 0x1c1   :  { %823 = vtanh.f32 %v545_v16  ;;  %v347_v35 = vpop.f32.mrf.mxu1 }
 0x1c2   :  { %825 = vrcp.f32 %v461_v27  ;;  %v404_v38 = vadd.f32 %v1266_v39, %v347_v35 }
 0x1c3   :  { %v810_v40 = vpop.eup %809  ;;  %827 = vpow2.f32 %v675_v31  ;;  %v1287_v41 = vpop.f32.mrf.mxu1 }
 0x1c4   :  { %v812_v42 = vpop.eup %811  ;;  %829 = vtanh.f32 %v546_v29  ;;  %v462_v43 = vadd.f32 1.0, %v810_v40  ;;  %v676_v44 = vmul.f32 -1.442695, %v404_v38 }
 0x1c5   :  { %831 = vtanh.f32 %v548_v33  ;;  %v464_v45 = vadd.f32 1.0, %v812_v42  ;;  %v353_v47 = vpop.f32.mrf.mxu1 }
 0x1c6   :  { %833 = vrcp.f32 %v462_v43  ;;  %v405_v48 = vadd.f32 %v1266_v39, %v353_v47 }
 0x1c7   :  { %v814_v49 = vpop.eup %813  ;;  %835 = vrcp.f32 %v464_v45  ;;  %v1291_v50 = vpop.f32.mrf.mxu1 }
 0x1c8   :  { %v816_v51 = vpop.eup %815  ;;  %v463_v52 = vadd.f32 1.0, %v814_v49  ;;  %837 = vpow2.f32 %v676_v44  ;;  %v677_v53 = vmul.f32 -1.442695, %v405_v48 }
 0x1c9   :  { %839 = vtanh.f32 %v547_v46  ;;  %v465_v58 = vadd.f32 1.0, %v816_v51  ;;  %v359_v59 = vpop.f32.mrf.mxu1 }
 0x1ca   :  { %841 = vrcp.f32 %v463_v52  ;;  %v406_v54 = vadd.f32 %v1266_v39, %v359_v59 }
 0x1cb   :  { %v818_v60 = vpop.eup %817  ;;  %843 = vrcp.f32 %v465_v58  ;;  %v1297_v62 = vpop.f32.mrf.mxu1 }
 0x1cc   :  { %v820_v1 = vpop.eup %819  ;;  %v524_v3 = vsub.f32 1.0, %v818_v60  ;;  %845 = vpow2.f32 %v677_v53  ;;  %v678_v6 = vmul.f32 -1.442695, %v406_v54  ;;  %v508_v2 = vmul.f32 %v818_v60, %v1202_v8 }
 0x1cd   :  { %v822_v7 = vpop.eup %821  ;;  %847 = vtanh.f32 %v549_v57  ;;  %v466_v10 = vadd.f32 1.0, %v820_v1  ;;  %v365_v13 = vpop.f32.mrf.mxu1 }
 0x1ce   :  { %v824_v16 = vpop.eup %823  ;;  %v576_v19 = vmul.f32 %v822_v7, %v524_v3  ;;  %849 = vpow2.f32 %v678_v6  ;;  %v407_v21 = vadd.f32 %v1266_v39, %v365_v13 }
 0x1cf   :  { %v826_v23 = vpop.eup %825  ;;  %851 = vrcp.f32 %v466_v10  ;;  %v1309_v27 = vpop.f32.mrf.mxu1 }
 0x1d0   :  { %v828_v29 = vpop.eup %827  ;;  %v592_v31 = vadd.f32 %v576_v19, %v508_v2  ;;  %v525_v33 = vsub.f32 1.0, %v826_v23  ;;  %853 = vtanh.f32 %v550_v5  ;;  %v679_v38 = vmul.f32 -1.442695, %v407_v21 }
 0x1d1   :  { %v830_v35 = vpop.eup %829  ;;  %855 = vtanh.f32 %v551_v12  ;;  %v467_v8 = vadd.f32 1.0, %v828_v29  ;;  %v371_v40 = vpop.f32.mrf.mxu1  ;;  %v509_v4 = vmul.f32 %v826_v23, %v1206_v11 }
 0x1d2   :  { %v832_v42 = vpop.eup %831  ;;  %v612_v43 = vmul.f32 %v1301_v55, %v592_v31  ;;  %v577_v44 = vmul.f32 %v824_v16, %v525_v33  ;;  %v408_v45 = vadd.f32 %v1266_v39, %v371_v40  ;;  %v553_v16 = vadd.f32 %v1276_v0, %v1287_v41 }
 0x1d3   :  { %v834_v46 = vpop.eup %833  ;;  %857 = vrcp.f32 %v467_v8  ;;  %v1316_v47 = vpop.f32.mrf.mxu1 }
 0x1d4   :  { %v836_v48 = vpop.eup %835  ;;  %v632_v25 = vadd.f32 %v1307_v63, %v612_v43  ;;  %v593_v49 = vadd.f32 %v577_v44, %v509_v4  ;;  %v526_v51 = vsub.f32 1.0, %v834_v46  ;;  %859 = vtanh.f32 %v552_v9 }
 0x1d5   :  { %v838_v52 = vpop.eup %837  ;;  %v528_v53 = vsub.f32 1.0, %v836_v48  ;;  %861 = vpow2.f32 %v679_v38  ;;  %v680_v56 = vmul.f32 -1.442695, %v408_v45  ;;  %v377_v57 = vpop.f32.mrf.mxu1  ;;  %v510_v59 = vmul.f32 %v834_v46, %v1210_v14 }
 0x1d6   :  { %v840_v58 = vpop.eup %839  ;;  %648 = vst [vmem:[%s1436_s4] sm:$0xff] %v632_v25  ;;  %v613_v11 = vmul.f32 %v1301_v55, %v593_v49  ;;  %v578_v54 = vmul.f32 %v830_v35, %v526_v51  ;;  %v468_v60 = vadd.f32 1.0, %v838_v52  ;;  %v512_v1 = vmul.f32 %v836_v48, %v1212_v15 }
 0x1d7   :  { %v842_v61 = vpop.eup %841  ;;  %v580_v3 = vmul.f32 %v832_v42, %v528_v53  ;;  %863 = vpow2.f32 %v680_v56  ;;  %v409_v5 = vadd.f32 %v1266_v39, %v377_v57  ;;  %v1326_v6 = vpop.f32.mrf.mxu1  ;;  %v554_v15 = vadd.f32 %v1276_v0, %v1291_v50 }
 0x1d8   :  { %v844_v7 = vpop.eup %843  ;;  %v633_v10 = vadd.f32 %v1307_v63, %v613_v11  ;;  %v594_v12 = vadd.f32 %v578_v54, %v510_v59  ;;  %v527_v13 = vsub.f32 1.0, %v842_v61  ;;  %865 = vrcp.f32 %v468_v60 }
 0x1d9   :  { %v846_v14 = vpop.eup %845  ;;  %v596_v2 = vadd.f32 %v580_v3, %v512_v1  ;;  %v529_v19 = vsub.f32 1.0, %v844_v7  ;;  %v383_v21 = vpop.f32.mrf.mxu1  ;;  %v511_v31 = vmul.f32 %v842_v61, %v1218_v17  ;;  %v513_v8 = vmul.f32 %v844_v7, %v1220_v18 }
 0x1da   :  { %v848_v23 = vpop.eup %847  ;;  %649 = vst [vmem:[%s1436_s4 + $0x8] sm:$0xff] %v633_v10  ;;  %v614_v29 = vmul.f32 %v1301_v55, %v594_v12  ;;  %v579_v33 = vmul.f32 %v840_v58, %v527_v13  ;;  %v469_v9 = vadd.f32 1.0, %v846_v14  ;;  %v681_v40 = vmul.f32 -1.442695, %v409_v5 }
 0x1db   :  { %v850_v41 = vpop.eup %849  ;;  %v616_v35 = vmul.f32 %v1301_v55, %v596_v2  ;;  %v581_v38 = vmul.f32 %v848_v23, %v529_v19  ;;  %v1340_v50 = vpop.f32.mrf.mxu1  ;;  %v410_v52 = vadd.f32 %v1266_v39, %v383_v21  ;;  %v555_v3 = vadd.f32 %v1276_v0, %v1297_v62 }
 0x1dc   :  { %v852_v42 = vpop.eup %851  ;;  %v634_v43 = vadd.f32 %v1307_v63, %v614_v29  ;;  %v595_v4 = vadd.f32 %v579_v33, %v511_v31  ;;  %867 = vrcp.f32 %v469_v9  ;;  %v470_v44 = vadd.f32 1.0, %v850_v41 }
 0x1dd   :  { %v854_v45 = vpop.eup %853  ;;  %v636_v17 = vadd.f32 %v1307_v63, %v616_v35  ;;  %v597_v46 = vadd.f32 %v581_v38, %v513_v8  ;;  %v530_v48 = vsub.f32 1.0, %v852_v42  ;;  %869 = vtanh.f32 %v553_v16  ;;  %v389_v25 = vpop.f32.mrf.mxu1 }
 0x1de   :  { %v856_v49 = vpop.eup %855  ;;  %650 = vst [vmem:[%s1436_s4 + $0x10] sm:$0xff] %v634_v43  ;;  %v615_v18 = vmul.f32 %v1301_v55, %v595_v4  ;;  %v514_v51 = vmul.f32 %v852_v42, %v1225_v20  ;;  %871 = vrcp.f32 %v470_v44  ;;  %v411_v57 = vadd.f32 %v1266_v39, %v389_v25 }
 0x1df   :  { %652 = vst [vmem:[%s1436_s4 + $0x20] sm:$0xff] %v636_v17  ;;  %v617_v53 = vmul.f32 %v1301_v55, %v597_v46  ;;  %v582_v56 = vmul.f32 %v854_v45, %v530_v48  ;;  %873 = vpow2.f32 %v681_v40  ;;  %v682_v59 = vmul.f32 -1.442695, %v410_v52 }
 0x1e0   :  { %v858_v58 = vpop.eup %857  ;;  %v635_v11 = vadd.f32 %v1307_v63, %v615_v18  ;;  %875 = vtanh.f32 %v554_v15  ;;  %v683_v39 = vmul.f32 -1.442695, %v411_v57  ;;  %v556_v16 = vadd.f32 %v1276_v0, %v1309_v27 }
 0x1e1   :  { %v860_v54 = vpop.eup %859  ;;  %v637_v20 = vadd.f32 %v1307_v63, %v617_v53  ;;  %v598_v60 = vadd.f32 %v582_v56, %v514_v51  ;;  %v531_v61 = vsub.f32 1.0, %v858_v58  ;;  %877 = vpow2.f32 %v682_v59 }
 0x1e2   :  { %v862_v1 = vpop.eup %861  ;;  %651 = vst [vmem:[%s1436_s4 + $0x18] sm:$0xff] %v635_v11  ;;  %v515_v7 = vmul.f32 %v858_v58, %v1229_v22  ;;  %879 = vpow2.f32 %v683_v39 }
 0x1e3   :  { %653 = vst [vmem:[%s1436_s4 + $0x28] sm:$0xff] %v637_v20  ;;  %v618_v5 = vmul.f32 %v1301_v55, %v598_v60  ;;  %v583_v10 = vmul.f32 %v856_v49, %v531_v61  ;;  %v471_v12 = vadd.f32 1.0, %v862_v1 }
 0x1e4   :  { %v864_v13 = vpop.eup %863 }
 0x1e5   :  { %v638_v14 = vadd.f32 %v1307_v63, %v618_v5  ;;  %v599_v62 = vadd.f32 %v583_v10, %v515_v7  ;;  %881 = vrcp.f32 %v471_v12  ;;  %v472_v2 = vadd.f32 1.0, %v864_v13  ;;  %v866_v19 = vpop.eup %865 }
 0x1e6   :  { %883 = vtanh.f32 %v555_v3  ;;  %v532_v15 = vsub.f32 1.0, %v866_v19  ;;  %v516_v27 = vmul.f32 %v866_v19, %v1233_v24  ;;  %v557_v24 = vadd.f32 %v1276_v0, %v1316_v47 }
 0x1e7   :  { %654 = vst [vmem:[%s1436_s4 + $0x30] sm:$0xff] %v638_v14  ;;  %v619_v22 = vmul.f32 %v1301_v55, %v599_v62  ;;  %885 = vrcp.f32 %v472_v2 }
 0x1e8   :  { %v584_v29 = vmul.f32 %v860_v54, %v532_v15  ;;  %887 = vtanh.f32 %v556_v16 }
 0x1e9   :  { %v868_v21 = vpop.eup %867  ;;  %v639_v23 = vadd.f32 %v1307_v63, %v619_v22 }
 0x1ea   :  { %v870_v31 = vpop.eup %869  ;;  %v533_v33 = vsub.f32 1.0, %v868_v21  ;;  %v600_v41 = vadd.f32 %v584_v29, %v516_v27  ;;  %v517_v8 = vmul.f32 %v868_v21, %v1237_v26  ;;  %v558_v26 = vadd.f32 %v1276_v0, %v1326_v6 }
 0x1eb   :  { %v872_v9 = vpop.eup %871  ;;  %655 = vst [vmem:[%s1436_s4 + $0x38] sm:$0xff] %v639_v23 }
 0x1ec   :  { %v874_v35 = vpop.eup %873  ;;  %v585_v38 = vmul.f32 %v870_v31, %v533_v33  ;;  %v534_v40 = vsub.f32 1.0, %v872_v9  ;;  %v620_v43 = vmul.f32 %v1301_v55, %v600_v41  ;;  %v518_v45 = vmul.f32 %v872_v9, %v1241_v28 }
 0x1ed   :  { %v876_v42 = vpop.eup %875  ;;  %v473_v4 = vadd.f32 1.0, %v874_v35  ;;  %v559_v28 = vadd.f32 %v1276_v0, %v1340_v50 }
 0x1ee   :  { %v601_v44 = vadd.f32 %v585_v38, %v517_v8  ;;  %v586_v17 = vmul.f32 %v876_v42, %v534_v40  ;;  %v878_v46 = vpop.eup %877  ;;  %v640_v48 = vadd.f32 %v1307_v63, %v620_v43 }
 0x1ef   :  { %889 = vrcp.f32 %v473_v4  ;;  %v474_v18 = vadd.f32 1.0, %v878_v46  ;;  %v880_v51 = vpop.eup %879 }
 0x1f0   :  { %v621_v25 = vmul.f32 %v1301_v55, %v601_v44  ;;  %v602_v49 = vadd.f32 %v586_v17, %v518_v45  ;;  %656 = vst [vmem:[%s1436_s4 + $0x40] sm:$0xff] %v640_v48  ;;  %891 = vtanh.f32 %v557_v24  ;;  %v475_v6 = vadd.f32 1.0, %v880_v51 }
 0x1f1   :  { %893 = vrcp.f32 %v474_v18 }
 0x1f2   :  { %v882_v47 = vpop.eup %881  ;;  %v641_v52 = vadd.f32 %v1307_v63, %v621_v25  ;;  %v622_v53 = vmul.f32 %v1301_v55, %v602_v49  ;;  %895 = vtanh.f32 %v558_v26 }
 0x1f3   :  { %v884_v56 = vpop.eup %883  ;;  %v535_v57 = vsub.f32 1.0, %v882_v47  ;;  %897 = vrcp.f32 %v475_v6  ;;  %v519_v0 = vmul.f32 %v882_v47, %v1245_v30 }
 0x1f4   :  { %v886_v58 = vpop.eup %885  ;;  %657 = vst [vmem:[%s1436_s4 + $0x48] sm:$0xff] %v641_v52  ;;  %v642_v11 = vadd.f32 %v1307_v63, %v622_v53  ;;  %899 = vtanh.f32 %v559_v28 }
 0x1f5   :  { %v587_v50 = vmul.f32 %v884_v56, %v535_v57  ;;  %v536_v59 = vsub.f32 1.0, %v886_v58  ;;  %v888_v54 = vpop.eup %887  ;;  %v520_v60 = vmul.f32 %v886_v58, %v1249_v32 }
 0x1f6   :  { %658 = vst [vmem:[%s1436_s4 + $0x50] sm:$0xff] %v642_v11 }
 0x1f7   :  { %v603_v20 = vadd.f32 %v587_v50, %v519_v0  ;;  %v588_v61 = vmul.f32 %v888_v54, %v536_v59 }
 0x1f9   :  { %v623_v1 = vmul.f32 %v1301_v55, %v603_v20  ;;  %v604_v3 = vadd.f32 %v588_v61, %v520_v60 }
 0x1fb   :  { %v643_v39 = vadd.f32 %v1307_v63, %v623_v1  ;;  %v624_v5 = vmul.f32 %v1301_v55, %v604_v3 }
 0x1fc   :  { %v890_v30 = vpop.eup %889 }
 0x1fd   :  { %659 = vst [vmem:[%s1436_s4 + $0x58] sm:$0xff] %v643_v39  ;;  %v644_v7 = vadd.f32 %v1307_v63, %v624_v5  ;;  %v537_v10 = vsub.f32 1.0, %v890_v30  ;;  %v892_v12 = vpop.eup %891  ;;  %v521_v32 = vmul.f32 %v890_v30, %v1253_v34 }
 0x1fe   :  { %v894_v13 = vpop.eup %893 }
 0x1ff   :  { %660 = vst [vmem:[%s1436_s4 + $0x60] sm:$0xff] %v644_v7  ;;  %v589_v16 = vmul.f32 %v892_v12, %v537_v10  ;;  %v896_v14 = vpop.eup %895  ;;  %v538_v62 = vsub.f32 1.0, %v894_v13  ;;  %v522_v22 = vmul.f32 %v894_v13, %v1257_v36 }
 0x200   :  { %v898_v2 = vpop.eup %897 }
 0x201   :  { %v605_v19 = vadd.f32 %v589_v16, %v521_v32  ;;  %v590_v15 = vmul.f32 %v896_v14, %v538_v62  ;;  %v539_v21 = vsub.f32 1.0, %v898_v2  ;;  %v900_v23 = vpop.eup %899  ;;  %v523_v31 = vmul.f32 %v898_v2, %v1261_v37 }
 0x203   :  { %v625_v27 = vmul.f32 %v1301_v55, %v605_v19  ;;  %v606_v29 = vadd.f32 %v590_v15, %v522_v22  ;;  %v591_v33 = vmul.f32 %v900_v23, %v539_v21 }
 0x205   :  { %v645_v9 = vadd.f32 %v1307_v63, %v625_v27  ;;  %v626_v34 = vmul.f32 %v1301_v55, %v606_v29  ;;  %v607_v41 = vadd.f32 %v591_v33, %v523_v31 }
 0x207   :  { %661 = vst [vmem:[%s1436_s4 + $0x68] sm:$0xff] %v645_v9  ;;  %v646_v36 = vadd.f32 %v1307_v63, %v626_v34  ;;  %v627_v35 = vmul.f32 %v1301_v55, %v607_v41 }
 0x209   :  { %662 = vst [vmem:[%s1436_s4 + $0x70] sm:$0xff] %v646_v36  ;;  %v647_v37 = vadd.f32 %v1307_v63, %v627_v35 }
 0x20b   :  { %663 = vst [vmem:[%s1436_s4 + $0x78] sm:$0xff] %v647_v37 }

</bundles_post_ra>
